<compile_context>
chip_gen: v6e
topology: v6e:2x2x1
jax: 0.10.0
libtpu: 0.0.40
codegen_flags: <defaults>
</compile_context>

<pallas_src>
import jax
import jax.numpy as jnp
from jax.experimental import pallas as pl
from jax.experimental.pallas import tpu as pltpu


_LANES = 128                            # vreg lane width (last dim)
_TARGET_BLOCK_BYTES = 2 * 1024 * 1024   # ~2 MiB per VMEM buffer per stream


def _swish_kernel(x_ref, o_ref):
    # Upcast to f32 so exp/reciprocal run at full precision; the extra VPU/EUP
    # work is hidden under the HBM DMA (kernel is memory-bound).
    x = x_ref[...].astype(jnp.float32)
    o_ref[...] = (x * jax.nn.sigmoid(x)).astype(o_ref.dtype)


def _sublane_min(itemsize: int) -> int:
    # f32 -> 8 sublanes, bf16/f16 -> 16, int8/fp8 -> 32 (sub-32-bit dtypes
    # pack along sublanes).
    return max(8, 32 // itemsize)


def _choose_block_rows(rows: int, itemsize: int) -> int:
    sub = _sublane_min(itemsize)
    max_rows = max(sub, (_TARGET_BLOCK_BYTES // (_LANES * itemsize)) // sub * sub)
    if rows <= sub:
        # Single block equal to the full array dim (allowed by the (8,128) rule).
        return rows
    # Aim for at least 2 grid steps (v7x has 2 TensorCores per chip), aligned
    # to the sublane minimum, capped at ~2 MiB per buffer.
    half = -(-rows // 2)
    half = -(-half // sub) * sub
    return min(max_rows, half)


def swish_forward(x, *, inplace=True):
    """Swish / SiLU: x * sigmoid(x) for any input shape, via a Pallas kernel."""
    orig_shape = x.shape
    orig_dtype = x.dtype
    total = x.size
    if total == 0:
        return x

    itemsize = jnp.dtype(orig_dtype).itemsize
    rows = -(-total // _LANES)
    pad = rows * _LANES - total  # non-zero only for a sub-128 tail

    x_flat = jnp.reshape(x, (total,))
    if pad:
        # TODO(synk): pad/slice fallback costs extra HBM copies; only hit when
        # total % 128 != 0 (uncommon for conv activation tensors).
        x_flat = jnp.pad(x_flat, (0, pad))
    x2d = jnp.reshape(x_flat, (rows, _LANES))

    block_rows = _choose_block_rows(rows, itemsize)
    grid = (pl.cdiv(rows, block_rows),)

    out2d = pl.pallas_call(
        _swish_kernel,
        out_shape=jax.ShapeDtypeStruct((rows, _LANES), orig_dtype),
        grid=grid,
        in_specs=[pl.BlockSpec((block_rows, _LANES), lambda i: (i, 0))],
        out_specs=pl.BlockSpec((block_rows, _LANES), lambda i: (i, 0)),
        # Emulate PyTorch inplace=True: output reuses the input HBM buffer
        # when the caller donates x (values identical either way).
        input_output_aliases=({0: 0} if inplace else {}),
        compiler_params=pltpu.CompilerParams(
            dimension_semantics=("parallel",)),
    )(x2d)

    out_flat = jnp.reshape(out2d, (rows * _LANES,))
    if pad:
        out_flat = out_flat[:total]
    return jnp.reshape(out_flat, orig_shape)


if __name__ == "__main__":
    key = jax.random.PRNGKey(0)
    x = jax.random.normal(key, (2, 4, 16, 16), jnp.float32)

    # Reference computed first: x is donated to the kernel call below.
    ref = x * jax.nn.sigmoid(x)

    swish = jax.jit(swish_forward, donate_argnums=0)
    out = jax.block_until_ready(swish(x))

    assert out.shape == ref.shape
    assert out.dtype == ref.dtype
    assert jnp.allclose(out, ref, atol=1e-6, rtol=1e-6), "mismatch vs reference"

    print("KERNEL_OK")
</pallas_src>

<mosaic_0001>
module attributes {stable_mosaic.version = 11 : i64} {
  func.func @_swish_kernel(%arg0: i32, %arg1: memref<8x128xf32, #tpu.memory_space<vmem>>, %arg2: memref<8x128xf32, #tpu.memory_space<vmem>>) attributes {dimension_semantics = [#tpu.dimension_semantics<parallel>], iteration_bounds = array<i64: 2>, scalar_prefetch = 0 : i64, scratch_operands = 0 : i64, tpu.core_type = #tpu.core_type<tc>, window_params = [{transform_indices = @transform_0, window_bounds = array<i64: 8, 128>}, {transform_indices = @transform_1, window_bounds = array<i64: 8, 128>}]} {
    %c0 = arith.constant 0 : index
    %c0_0 = arith.constant 0 : index
    %0 = vector.load %arg1[%c0, %c0_0] : memref<8x128xf32, #tpu.memory_space<vmem>>, vector<8x128xf32>
    %1 = arith.negf %0 : vector<8x128xf32>
    %2 = math.exp %1 : vector<8x128xf32>
    %cst = arith.constant 1.000000e+00 : f32
    %3 = vector.broadcast %cst : f32 to vector<8x128xf32>
    %4 = arith.addf %3, %2 : vector<8x128xf32>
    %5 = arith.divf %3, %4 : vector<8x128xf32>
    %6 = arith.mulf %0, %5 : vector<8x128xf32>
    %c0_1 = arith.constant 0 : index
    %c0_2 = arith.constant 0 : index
    %7 = vector.load %arg2[%c0_1, %c0_2] : memref<8x128xf32, #tpu.memory_space<vmem>>, vector<8x128xf32>
    tpu.vector_store %arg2[%c0_1, %c0_2], %6 {strides = array<i32>} : memref<8x128xf32, #tpu.memory_space<vmem>>, vector<8x128xf32>,
    return
  }
  func.func @transform_0(%arg0: i32) -> (i32, i32) {
    %c0_i32 = arith.constant 0 : i32
    %c0_i32_0 = arith.constant 0 : i32
    return %arg0, %c0_i32 : i32, i32
  }
  func.func @transform_1(%arg0: i32) -> (i32, i32) {
    %c0_i32 = arith.constant 0 : i32
    %c0_i32_0 = arith.constant 0 : i32
    return %arg0, %c0_i32 : i32, i32
  }
}

</mosaic_0001>

<bundles_post_ra>
// kernel: swish_forward.1
= control target key start
LH: loop header
LB: loop body
LE: loop exit
PB: predicated region body
PF: predicated region fallthrough
CT: control target
= control target key end

     0   :  { %s200_s6 = smov 0   ;;  %s220_s0 = inlined_call_operand.vmem [shape: f32[16,128], index: 0, kind: input, shape index: {}, may-alias: {0,1}]   ;;  %s221_s1 = inlined_call_operand.vmem [shape: f32[16,128], index: 1, kind: output, shape index: {}, may-alias: {0,1}]  }
   0x1 LB: > { %s174_s7 = sadd.s32 4294967295, %s202_s6   ;;  %p178_p0 = scmp.ge.s32.totalorder %s202_s6, 1  ;;  %s202_s6 = sphi %s200_s6, %s11_s6  }
   0x2   : > { %p86_p1 = scmp.lt.s32.totalorder %s202_s6, 3 }
   0x4   : > { %p87_p2 = pnand %p178_p0, %p86_p1 }
   0x5   : > { %p104_p3 = scmp.lt.s32.totalorder (!%p87_p2), %s174_s7, 1 }
   0x6   : > { %90 = sbr.rel (%p87_p2) target bundleno = 50 (0x32), region = 24 }
   0xb   : > { %s223_s7 = smov (!%p104_p3, %s174_s7), 1 }
   0xc   : > { %s179_s8 = sshll.u32 %s223_s7, 3 }
   0xd   : > { %s107_s11 = scalar_lea.vmem %s220_s0, %s179_s8  ;;  %s111_s14 = scalar_lea.vmem %s221_s1, %s179_s8 }
   0xe   : > { %v112_v0 = vld [vmem:[%s107_s11] sm:$0xff] }
   0xf   : > { %v181_v1 = vmul.f32 -1.442695, %v112_v0 }
  0x11   : > { %192 = vpow2.f32 %v181_v1 }
  0x1e   : > { %v193_v2 = vpop.eup %192 }
  0x1f   : > { %v116_v3 = vadd.f32 1.0, %v193_v2 }
  0x21   : > { %194 = vrcp.f32 %v116_v3 }
  0x2e   : > { %v195_v4 = vpop.eup %194 }
  0x2f   : > { %v119_v5 = vmul.f32 %v195_v4, %v112_v0 }
  0x31   : > { %120 = vst [vmem:[%s111_s14] sm:$0xff] %v119_v5 }
  0x32 PF: > { %s11_s6 = sadd.s32 1, %s202_s6  }
  0x33   : > { %p8_p4 = scmp.ge.s32.totalorder %s11_s6, 4  }
  0x35   :  { %10 = sbr.rel (!%p8_p4) target bundleno = 1 (0x1), region = 54 }

</bundles_post_ra>
